<compile_context>
chip_gen: v7x
topology: tpu7x:2x2x1
jax: 0.10.0
libtpu: 0.0.40
codegen_flags: <defaults>
</compile_context>

<pallas_src>
import jax
import jax.numpy as jnp
from jax.experimental import pallas as pl
from jax.experimental.pallas import tpu as pltpu


def _round_up(x, m):
    return ((x + m - 1) // m) * m


def _round_down(x, m):
    return max(m, (x // m) * m)


def _pick_block_b(B, S, E2, D, A, in_bytes, budget_bytes):
    """Largest batch tile whose per-grid-step VMEM footprint fits the budget."""
    granule = 16 if in_bytes < 4 else 8            # sublane packing granule (bf16 vs f32)
    per_row = (2 * S * E2 * in_bytes               # encoder tile, double-buffered
               + S * E2 * 4                        # in-kernel f32 upcast copy of the enc tile
               + 2 * D * in_bytes + D * 4          # decoder tile (+ upcast), negligible
               + 2 * S * A * 4                     # enc_proj + energy f32 temporaries
               + 6 * S * 4)                        # scores / transposed scores / exp / out
    fixed = 2 * ((D + E2) * A + A) * 4 + (2 << 20)  # resident weights + bias + compiler slack
    bb = max(1, (budget_bytes - fixed) // max(per_row, 1))
    bb = min(int(bb), 256, B)                      # diminishing returns past ~256 rows
    if bb >= B:
        if B < 2 * granule:
            return B                               # whole (small) batch in one tile
        bb = _round_up(-(-B // 2), granule)        # >= 2 grid steps so both v7x TCs get work
    return min(B, _round_down(bb, granule))


def _attention_kernel(dec_ref, enc_ref, wdec_ref, wenc_ref, b_ref, out_ref):
    # dec_ref : [Bt, D]        batch tile of decoder hidden states (bf16 or f32)
    # enc_ref : [S, Bt, E2]    encoder outputs, original seq-first layout (bf16 or f32)
    # wdec_ref: [D, A]  wenc_ref: [E2, A]  b_ref: [1, A]   (f32)
    # out_ref : [Bt, S]        softmax attention weights (f32)
    s, bt, e2 = enc_ref.shape
    f32 = jnp.float32

    # Linear(cat(dec, enc)) == dec @ Wdec + enc @ Wenc + b  -> two MXU matmuls, f32 math.
    dec = dec_ref[...].astype(f32)                                   # [Bt, D]
    q = jnp.dot(dec, wdec_ref[...], preferred_element_type=f32) + b_ref[...]   # [Bt, A]

    enc = enc_ref[...].astype(f32).reshape(s * bt, e2)               # one big MXU M dim
    enc_proj = jnp.dot(enc, wenc_ref[...],
                       preferred_element_type=f32).reshape(s, bt, -1)  # [S, Bt, A]

    energy = jnp.tanh(enc_proj + q[None, :, :])                      # [S, Bt, A]  (EUP tanh)
    scores = jnp.sum(energy, axis=2)                                 # [S, Bt]     (lane reduce)

    scores = jnp.transpose(scores)                                   # [Bt, S]     (small XLU xpose)
    m = jnp.max(scores, axis=1, keepdims=True)                       # [Bt, 1]
    e = jnp.exp(scores - m)                                          # [Bt, S]
    out = e / jnp.sum(e, axis=1, keepdims=True)                      # exact softmax normalization

    out_ref[...] = out.astype(out_ref.dtype)


def attention_pallas(decoder_hidden, encoder_outputs, weight, bias,
                     enc_hid_dim, dec_hid_dim, attn_dim, *,
                     block_b=None, matmul_dtype=jnp.bfloat16,
                     vmem_budget_bytes=40 * 1024 * 1024):
    """decoder_hidden: [B, dec_hid], encoder_outputs: [S, B, 2*enc_hid] (seq-first, untouched),
       weight: [attn_dim, attn_in], bias: [attn_dim]  ->  [B, S] softmax attention weights."""
    B, D = decoder_hidden.shape
    S = encoder_outputs.shape[0]
    E2 = 2 * enc_hid_dim
    A = attn_dim
    assert D == dec_hid_dim
    assert encoder_outputs.shape == (S, B, E2)
    assert weight.shape == (A, E2 + D) and bias.shape == (A,)

    in_dtype = jnp.float32 if matmul_dtype is None else matmul_dtype
    in_bytes = jnp.dtype(in_dtype).itemsize

    if block_b is None:
        block_b = _pick_block_b(B, S, E2, D, A, in_bytes, vmem_budget_bytes)
    block_b = max(1, min(block_b, B))
    grid = (pl.cdiv(B, block_b),)           # edge tile (if any) handled by Pallas bounds masking

    # Split & transpose the Linear weight (PyTorch cat order is [dec_hidden, encoder_outputs]).
    # Weights/bias stay f32: grid-invariant, tiny DMA, and keep accumulation numerics tight.
    w_dec = jnp.transpose(weight[:, :D]).astype(jnp.float32)         # [D,  A]
    w_enc = jnp.transpose(weight[:, D:]).astype(jnp.float32)         # [E2, A]
    b2d = bias.astype(jnp.float32)[None, :]                          # [1,  A]

    # Only the big per-step streams are narrowed (halves the dominant HBM traffic for bf16).
    dec = decoder_hidden.astype(in_dtype)
    enc = encoder_outputs.astype(in_dtype)                           # no transpose, no pad

    vmem_limit = int(vmem_budget_bytes + (16 << 20))                 # above v5e/v6e scoped defaults

    out = pl.pallas_call(
        _attention_kernel,
        out_shape=jax.ShapeDtypeStruct((B, S), jnp.float32),
        grid_spec=pltpu.PrefetchScalarGridSpec(
            num_scalar_prefetch=0,
            grid=grid,
            in_specs=[
                pl.BlockSpec((block_b, D), lambda i: (i, 0)),         # decoder tile
                pl.BlockSpec((S, block_b, E2), lambda i: (0, i, 0)),  # encoder tile, seq-first
                pl.BlockSpec((D, A), lambda i: (0, 0)),               # W_dec (resident)
                pl.BlockSpec((E2, A), lambda i: (0, 0)),              # W_enc (resident)
                pl.BlockSpec((1, A), lambda i: (0, 0)),               # bias  (resident)
            ],
            out_specs=pl.BlockSpec((block_b, S), lambda i: (i, 0)),
        ),
        compiler_params=pltpu.CompilerParams(
            dimension_semantics=("parallel",),    # batch tiles shard across v7x's 2 TensorCores
            vmem_limit_bytes=vmem_limit),
    )(dec, enc, w_dec, w_enc, b2d)

    return out


def attention_reference(decoder_hidden, encoder_outputs, weight, bias):
    """Pure-JAX mirror of the PyTorch forward, for verification."""
    S = encoder_outputs.shape[0]
    rep = jnp.repeat(decoder_hidden[:, None, :], S, axis=1)           # [B, S, dec_hid]
    enc = jnp.transpose(encoder_outputs, (1, 0, 2))                   # [B, S, 2*enc_hid]
    cat = jnp.concatenate([rep, enc], axis=2)                         # [B, S, attn_in]
    energy = jnp.tanh(jnp.einsum("bsi,ai->bsa", cat, weight) + bias)
    attention = jnp.sum(energy, axis=2)                               # [B, S]
    return jax.nn.softmax(attention, axis=1)


if __name__ == "__main__":
    # Small shapes consistent with the module
    enc_hid_dim, dec_hid_dim, attn_dim = 16, 32, 32
    batch, src_len = 2, 8
    attn_in = 2 * enc_hid_dim + dec_hid_dim

    key = jax.random.PRNGKey(0)
    k1, k2, k3, k4 = jax.random.split(key, 4)

    # Deterministic parameter init (mimics nn.Linear uniform(-1/sqrt(in), 1/sqrt(in)))
    bound = 1.0 / (attn_in ** 0.5)
    weight = jax.random.uniform(k1, (attn_dim, attn_in), jnp.float32, -bound, bound)
    bias = jax.random.uniform(k2, (attn_dim,), jnp.float32, -bound, bound)

    decoder_hidden = jax.random.normal(k3, (batch, dec_hid_dim), jnp.float32)
    encoder_outputs = jax.random.normal(k4, (src_len, batch, 2 * enc_hid_dim), jnp.float32)

    ref = attention_reference(decoder_hidden, encoder_outputs, weight, bias)

    # Exact f32 path: tight parity with the PyTorch/JAX reference.
    out_f32 = attention_pallas(decoder_hidden, encoder_outputs, weight, bias,
                               enc_hid_dim, dec_hid_dim, attn_dim, matmul_dtype=None)
    out_f32 = jax.block_until_ready(out_f32)
    assert out_f32.shape == (batch, src_len)
    assert jnp.allclose(out_f32, ref, atol=1e-3, rtol=1e-3), "f32 kernel mismatch vs reference"
    assert jnp.allclose(jnp.sum(out_f32, axis=1), 1.0, atol=1e-5), "softmax rows must sum to 1"

    # Default path (bf16 activation DMA, f32 math): looser elementwise check, exact row sums.
    out_bf16 = attention_pallas(decoder_hidden, encoder_outputs, weight, bias,
                                enc_hid_dim, dec_hid_dim, attn_dim)
    out_bf16 = jax.block_until_ready(out_bf16)
    assert out_bf16.shape == (batch, src_len)
    assert jnp.allclose(out_bf16, ref, atol=5e-2, rtol=5e-2), "bf16 kernel mismatch vs reference"
    assert jnp.allclose(jnp.sum(out_bf16, axis=1), 1.0, atol=1e-5), "softmax rows must sum to 1"

    print("KERNEL_OK")
</pallas_src>

<mosaic_0001>
module attributes {stable_mosaic.version = 11 : i64} {
  func.func @_attention_kernel(%arg0: i32, %arg1: memref<2x32xf32, #tpu.memory_space<vmem>>, %arg2: memref<8x2x32xf32, #tpu.memory_space<vmem>>, %arg3: memref<32x32xf32, #tpu.memory_space<vmem>>, %arg4: memref<32x32xf32, #tpu.memory_space<vmem>>, %arg5: memref<1x32xf32, #tpu.memory_space<vmem>>, %arg6: memref<2x8xf32, #tpu.memory_space<vmem>>) attributes {dimension_semantics = [#tpu.dimension_semantics<parallel>], iteration_bounds = array<i64: 1>, scalar_prefetch = 0 : i64, scratch_operands = 0 : i64, tpu.core_type = #tpu.core_type<tc>, window_params = [{transform_indices = @transform_0, window_bounds = array<i64: 2, 32>}, {transform_indices = @transform_1, window_bounds = array<i64: 8, 2, 32>}, {pipeline_mode = #tpu.pipeline_mode<synchronous>, transform_indices = @transform_2, window_bounds = array<i64: 32, 32>}, {pipeline_mode = #tpu.pipeline_mode<synchronous>, transform_indices = @transform_3, window_bounds = array<i64: 32, 32>}, {pipeline_mode = #tpu.pipeline_mode<synchronous>, transform_indices = @transform_4, window_bounds = array<i64: 1, 32>}, {transform_indices = @transform_5, window_bounds = array<i64: 2, 8>}]} {
    %c0 = arith.constant 0 : index
    %c0_0 = arith.constant 0 : index
    %0 = vector.load %arg1[%c0, %c0_0] : memref<2x32xf32, #tpu.memory_space<vmem>>, vector<2x32xf32>
    %c0_1 = arith.constant 0 : index
    %c0_2 = arith.constant 0 : index
    %1 = vector.load %arg3[%c0_1, %c0_2] : memref<32x32xf32, #tpu.memory_space<vmem>>, vector<32x32xf32>
    %cst = arith.constant dense<0.000000e+00> : vector<2x32xf32>
    %2 = tpu.matmul %0, %1, %cst {dimension_numbers = #tpu.dot_dimension_numbers<[1], [0], [0], [1], [0, 0, 1, 1], [], []>} : vector<2x32xf32>, vector<32x32xf32>, vector<2x32xf32> -> vector<2x32xf32>
    %c0_3 = arith.constant 0 : index
    %c0_4 = arith.constant 0 : index
    %3 = vector.load %arg5[%c0_3, %c0_4] : memref<1x32xf32, #tpu.memory_space<vmem>>, vector<1x32xf32>
    %4 = vector.broadcast %3 : vector<1x32xf32> to vector<2x32xf32>
    %5 = arith.addf %2, %4 : vector<2x32xf32>
    %c0_5 = arith.constant 0 : index
    %c0_6 = arith.constant 0 : index
    %c0_7 = arith.constant 0 : index
    %6 = vector.load %arg2[%c0_5, %c0_6, %c0_7] : memref<8x2x32xf32, #tpu.memory_space<vmem>>, vector<8x2x32xf32>
    %7 = vector.shape_cast %6 : vector<8x2x32xf32> to vector<16x32xf32>
    %c0_8 = arith.constant 0 : index
    %c0_9 = arith.constant 0 : index
    %8 = vector.load %arg4[%c0_8, %c0_9] : memref<32x32xf32, #tpu.memory_space<vmem>>, vector<32x32xf32>
    %cst_10 = arith.constant dense<0.000000e+00> : vector<16x32xf32>
    %9 = tpu.matmul %7, %8, %cst_10 {dimension_numbers = #tpu.dot_dimension_numbers<[1], [0], [0], [1], [0, 0, 1, 1], [], []>} : vector<16x32xf32>, vector<32x32xf32>, vector<16x32xf32> -> vector<16x32xf32>
    %10 = vector.shape_cast %9 : vector<16x32xf32> to vector<8x2x32xf32>
    %11 = vector.shape_cast %5 : vector<2x32xf32> to vector<1x2x32xf32>
    %12 = vector.broadcast %11 : vector<1x2x32xf32> to vector<8x2x32xf32>
    %13 = arith.addf %10, %12 : vector<8x2x32xf32>
    %14 = math.tanh %13 : vector<8x2x32xf32>
    %cst_11 = arith.constant dense<0.000000e+00> : vector<8x2xf32>
    %15 = vector.multi_reduction <add>, %14, %cst_11 [2] : vector<8x2x32xf32> to vector<8x2xf32>
    %16 = tpu.transpose %15, [1, 0] : vector<8x2xf32> -> vector<2x8xf32>
    %cst_12 = arith.constant dense<0xFF800000> : vector<2xf32>
    %17 = vector.multi_reduction <maximumf>, %16, %cst_12 [1] : vector<2x8xf32> to vector<2xf32>
    %18 = vector.shape_cast %17 : vector<2xf32> to vector<2x1xf32>
    %19 = vector.broadcast %18 : vector<2x1xf32> to vector<2x8xf32>
    %20 = arith.subf %16, %19 : vector<2x8xf32>
    %21 = math.exp %20 : vector<2x8xf32>
    %cst_13 = arith.constant dense<0.000000e+00> : vector<2xf32>
    %22 = vector.multi_reduction <add>, %21, %cst_13 [1] : vector<2x8xf32> to vector<2xf32>
    %23 = vector.shape_cast %22 : vector<2xf32> to vector<2x1xf32>
    %24 = vector.broadcast %23 : vector<2x1xf32> to vector<2x8xf32>
    %25 = arith.divf %21, %24 : vector<2x8xf32>
    %c0_14 = arith.constant 0 : index
    %c0_15 = arith.constant 0 : index
    %26 = vector.load %arg6[%c0_14, %c0_15] : memref<2x8xf32, #tpu.memory_space<vmem>>, vector<2x8xf32>
    tpu.vector_store %arg6[%c0_14, %c0_15], %25 {strides = array<i32>} : memref<2x8xf32, #tpu.memory_space<vmem>>, vector<2x8xf32>,
    return
  }
  func.func @transform_0(%arg0: i32) -> (i32, i32) {
    %c0_i32 = arith.constant 0 : i32
    %c0_i32_0 = arith.constant 0 : i32
    return %arg0, %c0_i32 : i32, i32
  }
  func.func @transform_1(%arg0: i32) -> (i32, i32, i32) {
    %c0_i32 = arith.constant 0 : i32
    %c0_i32_0 = arith.constant 0 : i32
    %c0_i32_1 = arith.constant 0 : i32
    return %c0_i32, %arg0, %c0_i32_0 : i32, i32, i32
  }
  func.func @transform_2(%arg0: i32) -> (i32, i32) {
    %c0_i32 = arith.constant 0 : i32
    %c0_i32_0 = arith.constant 0 : i32
    %c0_i32_1 = arith.constant 0 : i32
    return %c0_i32, %c0_i32_0 : i32, i32
  }
  func.func @transform_3(%arg0: i32) -> (i32, i32) {
    %c0_i32 = arith.constant 0 : i32
    %c0_i32_0 = arith.constant 0 : i32
    %c0_i32_1 = arith.constant 0 : i32
    return %c0_i32, %c0_i32_0 : i32, i32
  }
  func.func @transform_4(%arg0: i32) -> (i32, i32) {
    %c0_i32 = arith.constant 0 : i32
    %c0_i32_0 = arith.constant 0 : i32
    %c0_i32_1 = arith.constant 0 : i32
    return %c0_i32, %c0_i32_0 : i32, i32
  }
  func.func @transform_5(%arg0: i32) -> (i32, i32) {
    %c0_i32 = arith.constant 0 : i32
    %c0_i32_0 = arith.constant 0 : i32
    return %arg0, %c0_i32 : i32, i32
  }
}

</mosaic_0001>

<bundles_post_ra>
// kernel: tpu_custom_call.1
= control target key start
LH: loop header
LB: loop body
LE: loop exit
PB: predicated region body
PF: predicated region fallthrough
CT: control target
= control target key end

     0   :  { %10 = vsyncpa [#allocation3], 0  ;;  %s822_s0 = inlined_call_operand.hbm [shape: f32[2,32], index: 0, kind: input, shape index: {}]   ;;  %s823_s1 = inlined_call_operand.hbm [shape: f32[8,2,32], index: 1, kind: input, shape index: {}]   ;;  %s824_s2 = inlined_call_operand.hbm [shape: f32[32,32], index: 2, kind: input, shape index: {}]   ;;  %s825_s3 = inlined_call_operand.hbm [shape: f32[32,32], index: 3, kind: input, shape index: {}]   ;;  %s826_s4 = inlined_call_operand.vmem [shape: f32[1,32], index: 4, kind: input, shape index: {}]   ;;  %s827_s5 = inlined_call_operand.hbm [shape: f32[2,8], index: 5, kind: output, shape index: {}]  }
   0x1   :  { %11 = vsyncpa [#allocation6], 0 }
   0x2   :  { %12 = vsyncpa [#allocation9], 0 }
   0x3   :  { %13 = vsyncpa [#allocation4], 0  ;;  %s699_s18 = smov [#allocation5]   ;;  %s581_s22 = scalar_lea.hbm %s823_s1, 256 }
   0x4   :  { %s29_s19 = sshll.u32 %s699_s18, 4  ;;  %p582_p0 = scmp.ne.s32.totalorder %s823_s1, %s581_s22  ;;  %s30_s19 = int_to_ptr.vmem [resolvable:$true] %s29_s19 }
   0x5   :  { %p585_p1 = scmp.lt.u32.totalorder %s581_s22, %s823_s1 }
   0x7   :  { %p587_p2 = pnand %p585_p1, %p582_p0 }
   0x9   :  { %590 = shalt.err (!%p587_p2)
}
   0xa   :  { %s591_s27 = scalar_lea.vmem %s30_s19, 256  ;;  %p596_p4 = scmp.lt.s32.totalorder %s30_s19, %s30_s19 }
   0xb   :  { %p592_p3 = scmp.ne.s32.totalorder %s30_s19, %s591_s27  ;;  %p597_p5 = scmp.lt.s32.totalorder %s591_s27, %s591_s27 }
   0xd   :  { %p598_p6 = por %p597_p5, %p596_p4 }
   0xf   :  { %p599_p7 = pnand %p598_p6, %p592_p3 }
  0x11   :  { %602 = shalt.err (!%p599_p7)
}
  0x12   :  { %s700_s28 = smov 32   ;;  %s701_s29 = smov 2  }
  0x13   :  { %35 = dma.hbm_to_vmem [thread:$0]  %s823_s1, 256, %s30_s19, [#allocation6], %s700_s28, %s700_s28, %s701_s29  }
  0x14   :  { %s702_s7 = smov [#allocation2]   ;;  %s703_s9 = smov [#allocation7]  }
  0x15   :  { %s20_s8 = sshll.u32 %s702_s7, 4  ;;  %s41_s10 = sshll.u32 %s703_s9, 4  ;;  %s21_s8 = int_to_ptr.vmem [resolvable:$true] %s20_s8  ;;  %s42_s10 = int_to_ptr.vmem [resolvable:$true] %s41_s10 }
  0x16   :  { %s603_s13 = scalar_lea.hbm %s822_s0, 32 }
  0x17   :  { %p604_p8 = scmp.ne.s32.totalorder %s822_s0, %s603_s13  ;;  %p607_p9 = scmp.lt.u32.totalorder %s603_s13, %s822_s0 }
  0x19   :  { %p609_p10 = pnand %p607_p9, %p604_p8 }
  0x1b   :  { %612 = shalt.err (!%p609_p10)
}
  0x1c   :  { %s613_s1 = scalar_lea.vmem %s21_s8, 32  ;;  %p618_p12 = scmp.lt.s32.totalorder %s21_s8, %s21_s8 }
  0x1d   :  { %p614_p11 = scmp.ne.s32.totalorder %s21_s8, %s613_s1  ;;  %p619_p13 = scmp.lt.s32.totalorder %s613_s1, %s613_s1 }
  0x1f   :  { %p620_p0 = por %p619_p13, %p618_p12 }
  0x21   :  { %p621_p1 = pnand %p620_p0, %p614_p11 }
  0x23   :  { %624 = shalt.err (!%p621_p1)
}
  0x24   :  { %23 = dma.hbm_to_vmem [thread:$0]  %s822_s0, 32, %s21_s8, [#allocation3]  }
  0x25   :  { %s625_s22 = scalar_lea.hbm %s824_s2, 512 }
  0x26   :  { %p626_p2 = scmp.ne.s32.totalorder %s824_s2, %s625_s22  ;;  %p629_p3 = scmp.lt.u32.totalorder %s625_s22, %s824_s2 }
  0x28   :  { %p631_p4 = pnand %p629_p3, %p626_p2 }
  0x2a   :  { %634 = shalt.err (!%p631_p4)
}
  0x2b   :  { %s635_s27 = scalar_lea.vmem %s42_s10, 512  ;;  %p640_p6 = scmp.lt.s32.totalorder %s42_s10, %s42_s10 }
  0x2c   :  { %p636_p5 = scmp.ne.s32.totalorder %s42_s10, %s635_s27  ;;  %p641_p7 = scmp.lt.s32.totalorder %s635_s27, %s635_s27 }
  0x2e   :  { %p642_p8 = por %p641_p7, %p640_p6 }
  0x30   :  { %p643_p9 = pnand %p642_p8, %p636_p5 }
  0x32   :  { %646 = shalt.err (!%p643_p9)
}
  0x33   :  { %s704_s0 = smov 128   ;;  %s705_s28 = smov 8  }
  0x34   :  { %47 = dma.hbm_to_vmem [thread:$0]  %s824_s2, 512, %s42_s10, [#allocation6], %s704_s0, %s704_s0, %s705_s28  }
  0x35   :  { %s706_s6 = smov [#allocation8]   ;;  %s647_s11 = scalar_lea.hbm %s825_s3, 512 }
  0x36   :  { %s53_s7 = sshll.u32 %s706_s6, 4  ;;  %p648_p10 = scmp.ne.s32.totalorder %s825_s3, %s647_s11  ;;  %s54_s7 = int_to_ptr.vmem [resolvable:$true] %s53_s7 }
  0x37   :  { %p651_p11 = scmp.lt.u32.totalorder %s647_s11, %s825_s3 }
  0x39   :  { %p653_p12 = pnand %p651_p11, %p648_p10 }
  0x3b   :  { %656 = shalt.err (!%p653_p12)
}
  0x3c   :  { %s657_s16 = scalar_lea.vmem %s54_s7, 512  ;;  %p662_p0 = scmp.lt.s32.totalorder %s54_s7, %s54_s7 }
  0x3d   :  { %p658_p13 = scmp.ne.s32.totalorder %s54_s7, %s657_s16  ;;  %p663_p1 = scmp.lt.s32.totalorder %s657_s16, %s657_s16 }
  0x3f   :  { %p664_p2 = por %p663_p1, %p662_p0 }
  0x41   :  { %p665_p3 = pnand %p664_p2, %p658_p13 }
  0x43   :  { %668 = shalt.err (!%p665_p3)
}
  0x44   :  { %59 = dma.hbm_to_vmem [thread:$0]  %s825_s3, 512, %s54_s7, [#allocation9], %s704_s0, %s704_s0, %s705_s28  }
  0x45   :  { %691 = dma.done.wait [#allocation3], 32  }
  0x46   :  { %692 = vsyncadd [#allocation3], 4294967264 }
  0x47   :  { %693 = dma.done.wait [#allocation6], 768  }
  0x48   :  { %694 = vsyncadd [#allocation6], 4294966528 }
  0x49   :  { %695 = dma.done.wait [#allocation9], 512  }
  0x4a   :  { %696 = vsyncadd [#allocation9], 4294966784  ;;  %v707_v0 = vmov 0.0|0.0   ;;  %vm708_vm0 = vmmov 0   ;;  %v709_v1 = vmov 0.0   ;;  %v185_v2 = vlaneseq  ;;  %v168_v7 = vld [vmem:[#allocation8] sm:$0xff] }
  0x4b   :  { %534 = vmatprep.subr.bf16.mxu0 %v707_v0  ;;  %520 = vmatprep.mubr.msk.f32.mxu0 %vm708_vm0, %v709_v1  ;;  %v710_v3 = vmov 1983009808   ;;  %v169_v8 = vld [vmem:[#allocation8 + $0x8] sm:$0xff]  ;;  %v75_v9 = vld [vmem:[#allocation7] sm:$0xff]  ;;  %v170_v12 = vld [vmem:[#allocation8 + $0x10] sm:$0xff]  ;;  %vm86_vm1 = vcmask 261120  }
  0x4c   :  { %v183_v4 = vunpack.c.l.s4 %v710_v3  ;;  %v791_v6 = vshrl.u32 %v185_v2, 7  ;;  %v540_v10 = vpack.c.bf16 %v169_v8, %v168_v7  ;;  %v76_v11 = vld [vmem:[#allocation7 + $0x8] sm:$0xff]  ;;  %v171_v13 = vld [vmem:[#allocation8 + $0x18] sm:$0xff]  ;;  %v77_v16 = vld [vmem:[#allocation7 + $0x10] sm:$0xff]  ;;  %vm353_vm2 = vcmask 254976  }
  0x4d   :  { %v535_v14 = vpack.c.bf16 %v76_v11, %v75_v9  ;;  %v544_v15 = vpack.c.bf16 %v171_v13, %v170_v12  ;;  %v78_v17 = vld [vmem:[#allocation7 + $0x18] sm:$0xff]  ;;  %v160_v18 = vld [vmem:[#allocation5] sm:$0x3]  ;;  %v161_v20 = vld [vmem:[#allocation5 + $0x2] sm:$0x3]  ;;  %vm420_vm3 = vcmask 1041409  }
  0x4e   :  { %v184_v5 = vunpack.c.0.s8 %v183_v4  ;;  %541 = vmatprep.subr.bf16.mxu1 %v540_v10  ;;  %v162_v21 = vld [vmem:[#allocation5 + $0x4] sm:$0x3]  ;;  %v163_v22 = vld [vmem:[#allocation5 + $0x6] sm:$0x3]  ;;  %v538_v23 = vpack.c.bf16 %v78_v17, %v77_v16  ;;  %v180_v24 = vcombine.low %v160_v18, %v161_v20  ;;  %v164_v26 = vld [vmem:[#allocation5 + $0x8] sm:$0x3] }
  0x4f   :  { %536 = vmatpush3.bf16.msra.mxu0 %v535_v14  ;;  %543 = vmatpush3.bf16.msra.mxu1 %v540_v10  ;;  %v181_v25 = vcombine.low %v162_v21, %v163_v22  ;;  %v165_v27 = vld [vmem:[#allocation5 + $0xa] sm:$0x3]  ;;  %v166_v28 = vld [vmem:[#allocation5 + $0xc] sm:$0x3]  ;;  %v167_v29 = vld [vmem:[#allocation5 + $0xe] sm:$0x3] }
  0x50   :  { %v187_v19 = vsub.s32 %v184_v5, %v791_v6  ;;  %537 = vmatprep.subr.bf16.mxu0 %v707_v0  ;;  %545 = vmatprep.subr.bf16.mxu1 %v544_v15  ;;  %v197_v30 = vcombine.low %v164_v26, %v165_v27  ;;  %v198_v33 = vcombine.low %v166_v28, %v167_v29  ;;  %v74_v36 = vld [vmem:[#allocation2] sm:$0x3]  ;;  %v387_v17 = vand.u32 127, %v185_v2 }
  0x51   :  { %v497_v39 = vld [vmem:[%s826_s4] ss:$0 sm:$0xff]  ;;  %vm422_vm4 = vcmask 1042434   ;;  %vm424_vm5 = vcmask 1043459   ;;  %vm426_vm6 = vcmask 1044484   ;;  %vm428_vm7 = vcmask 1045509  }
  0x52   :  { %v188_v31 = vrot.slane %v180_v24, %v187_v19  ;;  %v195_v32 = vrot.slane %v181_v25, %v187_v19  ;;  %v205_v34 = vrot.slane %v197_v30, %v187_v19  ;;  %v212_v37 = vrot.slane %v198_v33, %v187_v19  ;;  %s711_s4 = smov [#allocation10]  }
  0x53   :  { %539 = vmatpush3.bf16.msra.mxu0 %v538_v23  ;;  %547 = vmatpush3.bf16.msra.mxu1 %v544_v15  ;;  %v390_v20 = vsub.s32 %v387_v17, %v791_v6  ;;  %vm430_vm8 = vcmask 1046534   ;;  %vm432_vm9 = vcmask 1047559   ;;  %vm467_vm10 = vcmask 58368   ;;  %s486_s1 = sshll.u32 %s711_s4, 4  ;;  %s487_s1 = int_to_ptr.vmem [resolvable:$true] %s486_s1 }
  0x54   :  { %v196_v35 = vcombine.low %v188_v31, %v195_v32  ;;  %v213_v38 = vcombine.low %v205_v34, %v212_v37  ;;  %s669_s18 = scalar_lea.vmem %s487_s1, 32  ;;  %p674_p5 = scmp.lt.s32.totalorder %s487_s1, %s487_s1 }
  0x55   :  { %p670_p4 = scmp.ne.s32.totalorder %s487_s1, %s669_s18  ;;  %p675_p6 = scmp.lt.s32.totalorder %s669_s18, %s669_s18 }
  0x56   :  { %531 = vmatprep.mubr.msk.f32.mxu1 %vm86_vm1, %v196_v35  ;;  %521 = vmatmul.mubr.msk.f32.vlgmr.msra.gmra.mrb[0].mxu0 %vm86_vm1, %v74_v36 }
  0x57   :  { %532 = vmatmul.mubr.msk.f32.vlgmr.msra.gmra.mrb[0].mxu1 %vm86_vm1, %v213_v38  ;;  %p676_p7 = por %p675_p6, %p674_p5 }
  0x59   :  { %p677_p8 = pnand %p676_p7, %p670_p4 }
 0x129   :  { %v156_v40 = vpop.f32.mrb[0].mxu0 }
 0x12a   :  { %v157_v41 = vadd.f32 %v497_v39, %v156_v40  ;;  %v533_v42 = vpop.f32.mrb[0].mxu1  ;;  %v522_v43 = vpop.f32.mrb[1].mxu0 }
 0x12b   :  { %v312_v44 = vcombine.high %v533_v42, %v533_v42  ;;  %v319_v45 = vrot.slane %v533_v42, %v187_v19  ;;  %v284_v46 = vpop.f32.mrb[1].mxu1 }
 0x12c   :  { %v295_v47 = vcombine.high %v284_v46, %v284_v46  ;;  %v302_v48 = vrot.slane %v284_v46, %v187_v19 }
 0x12d   :  { %v326_v49 = vrot.slane %v312_v44, %v187_v19  ;;  %v327_v50 = vcombine.high %v319_v45, %v319_v45  ;;  %v341_v51 = vadd.f32 %v319_v45, %v157_v41 }
 0x12e   :  { %v309_v52 = vrot.slane %v295_v47, %v187_v19  ;;  %v310_v53 = vcombine.high %v302_v48, %v302_v48  ;;  %v337_v54 = vadd.f32 %v302_v48, %v157_v41 }
 0x12f   :  { %v328_v55 = vcombine.high %v326_v49, %v326_v49  ;;  %v342_v56 = vadd.f32 %v327_v50, %v157_v41  ;;  %v343_v57 = vadd.f32 %v326_v49, %v157_v41 }
 0x130   :  { %v311_v58 = vcombine.high %v309_v52, %v309_v52  ;;  %v338_v59 = vadd.f32 %v310_v53, %v157_v41  ;;  %v339_v60 = vadd.f32 %v309_v52, %v157_v41  ;;  %561 = vtanh.f32 %v337_v54 }
 0x131   :  { %v344_v61 = vadd.f32 %v328_v55, %v157_v41  ;;  %563 = vtanh.f32 %v342_v56 }
 0x132   :  { %v340_v62 = vadd.f32 %v311_v58, %v157_v41  ;;  %565 = vtanh.f32 %v338_v59 }
 0x133   :  { %567 = vtanh.f32 %v339_v60 }
 0x134   :  { %569 = vtanh.f32 %v341_v51 }
 0x135   :  { %571 = vtanh.f32 %v340_v62 }
 0x136   :  { %573 = vtanh.f32 %v343_v57 }
 0x137   :  { %575 = vtanh.f32 %v344_v61 }
 0x13a   :  { %v562_v63 = vpop.eup %561 }
 0x13b   :  { %v564_v0 = vpop.eup %563  ;;  %v354_v1 = vsel %vm353_vm2, %v562_v63, 0.0 }
 0x13c   :  { %355 = vadd.xlane.f32.xlu0 %v354_v1  ;;  %v369_v3 = vsel %vm353_vm2, %v564_v0, 0.0  ;;  %v566_v4 = vpop.eup %565 }
 0x13d   :  { %370 = vadd.xlane.f32.xlu1 %v369_v3  ;;  %v568_v5 = vpop.eup %567  ;;  %v357_v7 = vsel %vm353_vm2, %v566_v4, 0.0 }
 0x13e   :  { %v570_v8 = vpop.eup %569  ;;  %v360_v9 = vsel %vm353_vm2, %v568_v5, 0.0 }
 0x13f   :  { %v572_v10 = vpop.eup %571  ;;  %v366_v11 = vsel %vm353_vm2, %v570_v8, 0.0 }
 0x140   :  { %358 = vadd.xlane.f32.xlu0 %v357_v7  ;;  %v574_v12 = vpop.eup %573  ;;  %v363_v13 = vsel %vm353_vm2, %v572_v10, 0.0 }
 0x141   :  { %361 = vadd.xlane.f32.xlu1 %v360_v9  ;;  %v576_v14 = vpop.eup %575  ;;  %v372_v15 = vsel %vm353_vm2, %v574_v12, 0.0 }
 0x142   :  { %v375_v16 = vsel %vm353_vm2, %v576_v14, 0.0 }
 0x144   :  { %367 = vadd.xlane.f32.xlu0 %v366_v11 }
 0x145   :  { %364 = vadd.xlane.f32.xlu1 %v363_v13 }
 0x148   :  { %373 = vadd.xlane.f32.xlu0 %v372_v15 }
 0x149   :  { %376 = vadd.xlane.f32.xlu1 %v375_v16 }
 0x1c9   :  { %v356_v18 = vpop.xlane.xlu0 %355 }
 0x1ca   :  { %v371_v19 = vpop.xlane.xlu1 %370  ;;  %v391_v24 = vrot.slane %v356_v18, %v390_v20 }
 0x1cb   :  { %v411_v2 = vrot.slane %v371_v19, %v390_v20 }
 0x1cd   :  { %v359_v21 = vpop.xlane.xlu0 %358 }
 0x1ce   :  { %v395_v22 = vrot.slane %v359_v21, %v390_v20  ;;  %v362_v23 = vpop.xlane.xlu1 %361 }
 0x1cf   :  { %v399_v25 = vrot.slane %v362_v23, %v390_v20 }
 0x1d0   :  { %v421_v26 = vsel %vm420_vm3, %v395_v22, %v391_v24 }
 0x1d1   :  { %v368_v27 = vpop.xlane.xlu0 %367  ;;  %v423_v30 = vsel %vm422_vm4, %v399_v25, %v421_v26 }
 0x1d2   :  { %v365_v28 = vpop.xlane.xlu1 %364  ;;  %v407_v31 = vrot.slane %v368_v27, %v390_v20 }
 0x1d3   :  { %v403_v29 = vrot.slane %v365_v28, %v390_v20 }
 0x1d5   :  { %v425_v32 = vsel %vm424_vm5, %v403_v29, %v423_v30  ;;  %v374_v33 = vpop.xlane.xlu0 %373 }
 0x1d6   :  { %v415_v6 = vrot.slane %v374_v33, %v390_v20  ;;  %v377_v34 = vpop.xlane.xlu1 %376  ;;  %v427_v35 = vsel %vm426_vm6, %v407_v31, %v425_v32 }
 0x1d7   :  { %v419_v36 = vrot.slane %v377_v34, %v390_v20  ;;  %v429_v37 = vsel %vm428_vm7, %v411_v2, %v427_v35 }
 0x1d8   :  { %v431_v38 = vsel %vm430_vm8, %v415_v6, %v429_v37 }
 0x1d9   :  { %v433_v39 = vsel %vm432_vm9, %v419_v36, %v431_v38 }
 0x1da   :  { %435 = vxpose.xlu0.b32.start.end [1/1] (short) (narrow) %v433_v39, 8 }
 0x25a   :  { %v451_v40 = vpop.trf.xlu0 }
 0x25b   :  { %v468_v41 = vsel %vm467_vm10, %v451_v40, -inf }
 0x25c   :  { %469 = vmax.xlane.f32.xlu1 %v468_v41 }
 0x2e9   :  { %v470_v42 = vpop.xlane.xlu1 %469 }
 0x2ea   :  { %v471_v43 = vsub.f32 %v451_v40, %v470_v42 }
 0x2ec   :  { %v472_v44 = vmul.f32 1.442695, %v471_v43 }
 0x2ee   :  { %577 = vpow2.f32 %v472_v44 }
 0x2f8   :  { %v578_v45 = vpop.eup %577 }
 0x2f9   :  { %v474_v46 = vsel %vm467_vm10, %v578_v45, 0.0 }
 0x2fa   :  { %475 = vadd.xlane.f32.xlu1 %v474_v46 }
 0x387   :  { %v476_v47 = vpop.xlane.xlu1 %475 }
 0x388   :  { %579 = vrcp.f32 %v476_v47 }
 0x392   :  { %v580_v48 = vpop.eup %579 }
 0x393   :  { %v478_v49 = vmul.f32 %v580_v48, %v578_v45 }
 0x395   :  { %479 = vst.msk [vmem:[#allocation10] sm:$0x3] %vm467_vm10, %v478_v49 }
 0x396   :  { %680 = shalt.err (!%p677_p8)
}
 0x397   :  { %s681_s21 = scalar_lea.hbm %s827_s5, 32 }
 0x398   :  { %p682_p9 = scmp.ne.s32.totalorder %s827_s5, %s681_s21  ;;  %p685_p10 = scmp.lt.u32.totalorder %s681_s21, %s827_s5 }
 0x39a   :  { %p687_p11 = pnand %p685_p10, %p682_p9 }
 0x39c   :  { %690 = shalt.err (!%p687_p11)
}
 0x39d   :  { %489 = dma.vmem_to_hbm [thread:$0]  %s487_s1, 32, %s827_s5, [#allocation4]  }
 0x39e   :  { %697 = dma.done.wait [#allocation4], 32  }
 0x39f   :  { %698 = vsyncadd [#allocation4], 4294967264 }
 0x3a0   :  { %493 = vsyncpa [#allocation3], 1 }
 0x3a1   :  { %494 = vsyncpa [#allocation6], 1 }
 0x3a2   :  { %495 = vsyncpa [#allocation9], 1 }
 0x3a3   :  { %496 = vsyncpa [#allocation4], 1 }

</bundles_post_ra>
